<compile_context>
chip_gen: v5e
topology: v5e:2x2
jax: 0.10.0
libtpu: 0.0.40
codegen_flags: <defaults>
</compile_context>

<pallas_src>
import functools

import jax
import jax.numpy as jnp
import numpy as np
from jax.experimental import pallas as pl
from jax.experimental.pallas import tpu as pltpu


def _bayes_lstm_kernel(x_ref, h0_ref, c0_ref, w_ref, b_ref, wo_ref, bo_ref,
                       out_ref, comb_ref):
    """Whole sequence in a single kernel invocation (no grid).

    x_ref    : (Bp, S, D)  compute dtype   whole sequence, VMEM resident
    h0/c0    : (Bp, H)     f32             initial state
    w_ref    : (D+H, 4H)   compute dtype   fused gate weights [i, f, o, g]
    b_ref    : (1, 4H)     f32             fused gate bias    [i, f, o, g]
    wo_ref   : (H, Op)     compute dtype   lane-padded output projection
    bo_ref   : (1, Op)     f32
    out_ref  : (Bp, Op)    f32             lane-dense output
    comb_ref : (Bp, D+H)   compute dtype   persistent [x_t | h_t] scratch
    """
    Bp, S, D = x_ref.shape
    H = h0_ref.shape[1]
    cd = comb_ref.dtype

    # State kept in f32 (VPU/EUP math stays f32 on every TPU generation);
    # only MXU operands live in `cd` (bf16 on v6e/v7x, f32 on v5e).
    comb_ref[:, D:] = h0_ref[...].astype(cd)
    h = h0_ref[...]
    c = c0_ref[...]
    b = b_ref[...]

    # Static-unrolled time loop: S is a trace-time constant and the whole
    # problem fits VMEM, so there is zero per-step pipeline/grid overhead.
    for t in range(S):
        comb_ref[:, :D] = x_ref[:, t, :].astype(cd)
        # Single fused lane-dense matmul: (Bp, D+H) @ (D+H, 4H), f32 accum.
        pre = jnp.dot(comb_ref[...], w_ref[...],
                      preferred_element_type=jnp.float32) + b      # (Bp, 4H)
        # Gates packed [i, f, o, g]: one sigmoid over the 3H slab, one tanh.
        ifo = jax.nn.sigmoid(pre[:, :3 * H])
        i_t = ifo[:, :H]
        f_t = ifo[:, H:2 * H]
        o_t = ifo[:, 2 * H:]
        g_t = jnp.tanh(pre[:, 3 * H:])
        c = f_t * c + i_t * g_t
        h = o_t * jnp.tanh(c)
        comb_ref[:, D:] = h.astype(cd)

    # Final projection; Op is a multiple of 128 so this store is a dense vst.
    out_ref[...] = (jnp.dot(h.astype(cd), wo_ref[...],
                            preferred_element_type=jnp.float32)
                    + bo_ref[...]).astype(out_ref.dtype)


def _round_up(v, m):
    return ((v + m - 1) // m) * m


@functools.partial(jax.jit, static_argnames=("compute_dtype",))
def bayes_lstm_forward(x, h0, c0, w, b, wo, bo, *, compute_dtype=jnp.float32):
    """Deterministic (mean-weight) BayesLSTM forward.

    x  : (B, S, D) f32   PyTorch batch-major layout (no host transpose)
    h0 : (B, H) f32      c0 : (B, H) f32
    w  : (D+H, 4H) f32   fused gate weights, gate order [i, f, o, g];
                         rows [:D] = input->gate, rows [D:] = hidden->gate
    b  : (1, 4H) f32     fused gate bias, same gate order
    wo : (H, O) f32      bo : (1, O) f32
    Returns (B, O) f32.
    """
    B, S, D = x.shape
    H = h0.shape[1]
    O = wo.shape[1]
    cd = compute_dtype

    Bp = _round_up(max(B, 8), 8)        # fill the 8 sublane rows of a vreg
    Op = _round_up(max(O, 128), 128)    # lane-dense output store

    x_p = jnp.zeros((Bp, S, D), cd).at[:B].set(x.astype(cd))
    h0_p = jnp.zeros((Bp, H), jnp.float32).at[:B].set(h0)
    c0_p = jnp.zeros((Bp, H), jnp.float32).at[:B].set(c0)
    wo_p = jnp.zeros((H, Op), cd).at[:, :O].set(wo.astype(cd))
    bo_p = jnp.zeros((1, Op), jnp.float32).at[:, :O].set(bo)

    out = pl.pallas_call(
        _bayes_lstm_kernel,
        out_shape=jax.ShapeDtypeStruct((Bp, Op), jnp.float32),
        scratch_shapes=[pltpu.VMEM((Bp, D + H), cd)],
    )(x_p, h0_p, c0_p, w.astype(cd), b.astype(jnp.float32), wo_p, bo_p)
    return out[:B, :O]


def _reference(x, h0, c0, w, b, wo, bo):
    """Pure-JAX reference of the same forward pass (gate order [i, f, o, g])."""
    B, S, D = x.shape
    H = h0.shape[1]
    h, c = h0, c0
    for t in range(S):
        comb = jnp.concatenate([x[:, t, :], h], axis=1)
        pre = comb @ w + b
        i = jax.nn.sigmoid(pre[:, :H])
        f = jax.nn.sigmoid(pre[:, H:2 * H])
        o = jax.nn.sigmoid(pre[:, 2 * H:3 * H])
        g = jnp.tanh(pre[:, 3 * H:])
        c = f * c + i * g
        h = o * jnp.tanh(c)
    return h @ wo + bo


if __name__ == "__main__":
    # Small shapes consistent with the module's forward: x (batch, seq, in).
    B, S, D, H, O = 2, 8, 16, 32, 8

    key = jax.random.PRNGKey(0)
    ks = jax.random.split(key, 7)

    x = jax.random.normal(ks[0], (B, S, D), dtype=jnp.float32)

    # init_zero_hidden -> kaiming_normal_ on (B, H): std = sqrt(2 / H)
    h0 = jax.random.normal(ks[1], (B, H), dtype=jnp.float32) * np.sqrt(2.0 / H)
    c0 = jax.random.normal(ks[2], (B, H), dtype=jnp.float32) * np.sqrt(2.0 / H)

    # BayesLinear mean weights (sampling=False path).  Torch stores (out, in)
    # with F.linear(x, W, b) = x @ W.T + b; here we keep the pre-transposed
    # fused layout: w[:, g*H:(g+1)*H] = W_mu_g.T for gate order [i, f, o, g].
    scale = 1.0 / np.sqrt(D + H)
    w = jax.random.uniform(ks[3], (D + H, 4 * H), jnp.float32, -scale, scale)
    b = jax.random.uniform(ks[4], (1, 4 * H), jnp.float32, -scale, scale)

    scale_o = 1.0 / np.sqrt(H)
    wo = jax.random.uniform(ks[5], (H, O), jnp.float32, -scale_o, scale_o)
    bo = jax.random.uniform(ks[6], (1, O), jnp.float32, -scale_o, scale_o)

    ref = _reference(x, h0, c0, w, b, wo, bo)

    # f32 MXU-operand path (v5e-safe default).
    out_f32 = jax.block_until_ready(
        bayes_lstm_forward(x, h0, c0, w, b, wo, bo,
                           compute_dtype=jnp.float32))
    np.testing.assert_allclose(np.asarray(out_f32), np.asarray(ref),
                               rtol=1e-2, atol=1e-2)

    # bf16 MXU operands, f32 accumulation + f32 state (v6e / v7x fast path).
    out_bf16 = jax.block_until_ready(
        bayes_lstm_forward(x, h0, c0, w, b, wo, bo,
                           compute_dtype=jnp.bfloat16))
    np.testing.assert_allclose(np.asarray(out_bf16), np.asarray(ref),
                               rtol=5e-2, atol=5e-2)

    assert out_f32.shape == (B, O) and out_f32.dtype == jnp.float32
    print("KERNEL_OK")
</pallas_src>

<mosaic_0001>
module attributes {stable_mosaic.version = 11 : i64} {
  func.func @_bayes_lstm_kernel(%arg0: memref<8x8x16xf32, #tpu.memory_space<vmem>>, %arg1: memref<8x32xf32, #tpu.memory_space<vmem>>, %arg2: memref<8x32xf32, #tpu.memory_space<vmem>>, %arg3: memref<48x128xf32, #tpu.memory_space<vmem>>, %arg4: memref<1x128xf32, #tpu.memory_space<vmem>>, %arg5: memref<32x128xf32, #tpu.memory_space<vmem>>, %arg6: memref<1x128xf32, #tpu.memory_space<vmem>>, %arg7: memref<8x128xf32, #tpu.memory_space<vmem>>, %arg8: memref<8x48xf32, #tpu.memory_space<vmem>>) attributes {dimension_semantics = [], scalar_prefetch = 0 : i64, scratch_operands = 1 : i64, tpu.core_type = #tpu.core_type<tc>} {
    %c0 = arith.constant 0 : index
    %c0_0 = arith.constant 0 : index
    %0 = vector.load %arg1[%c0, %c0_0] : memref<8x32xf32, #tpu.memory_space<vmem>>, vector<8x32xf32>
    %c0_1 = arith.constant 0 : index
    %c16 = arith.constant 16 : index
    %1 = vector.load %arg8[%c0_1, %c16] : memref<8x48xf32, #tpu.memory_space<vmem>>, vector<8x32xf32>
    tpu.vector_store %arg8[%c0_1, %c16], %0 {strides = array<i32>} : memref<8x48xf32, #tpu.memory_space<vmem>>, vector<8x32xf32>,
    %c0_2 = arith.constant 0 : index
    %c0_3 = arith.constant 0 : index
    %2 = vector.load %arg2[%c0_2, %c0_3] : memref<8x32xf32, #tpu.memory_space<vmem>>, vector<8x32xf32>
    %c0_4 = arith.constant 0 : index
    %c0_5 = arith.constant 0 : index
    %3 = vector.load %arg4[%c0_4, %c0_5] : memref<1x128xf32, #tpu.memory_space<vmem>>, vector<1x128xf32>
    %c0_6 = arith.constant 0 : index
    %c0_7 = arith.constant 0 : index
    %c0_8 = arith.constant 0 : index
    %4 = vector.load %arg0[%c0_6, %c0_7, %c0_8] : memref<8x8x16xf32, #tpu.memory_space<vmem>>, vector<8x1x16xf32>
    %5 = vector.shape_cast %4 : vector<8x1x16xf32> to vector<8x16xf32>
    %c0_9 = arith.constant 0 : index
    %c0_10 = arith.constant 0 : index
    %6 = vector.load %arg8[%c0_9, %c0_10] : memref<8x48xf32, #tpu.memory_space<vmem>>, vector<8x16xf32>
    tpu.vector_store %arg8[%c0_9, %c0_10], %5 {strides = array<i32>} : memref<8x48xf32, #tpu.memory_space<vmem>>, vector<8x16xf32>,
    %c0_11 = arith.constant 0 : index
    %c0_12 = arith.constant 0 : index
    %7 = vector.load %arg8[%c0_11, %c0_12] : memref<8x48xf32, #tpu.memory_space<vmem>>, vector<8x48xf32>
    %c0_13 = arith.constant 0 : index
    %c0_14 = arith.constant 0 : index
    %8 = vector.load %arg3[%c0_13, %c0_14] : memref<48x128xf32, #tpu.memory_space<vmem>>, vector<48x128xf32>
    %cst = arith.constant dense<0.000000e+00> : vector<8x128xf32>
    %9 = tpu.matmul %7, %8, %cst {dimension_numbers = #tpu.dot_dimension_numbers<[1], [0], [0], [1], [0, 0, 1, 1], [], []>} : vector<8x48xf32>, vector<48x128xf32>, vector<8x128xf32> -> vector<8x128xf32>
    %10 = vector.broadcast %3 : vector<1x128xf32> to vector<8x128xf32>
    %11 = arith.addf %9, %10 : vector<8x128xf32>
    %12 = vector.extract_strided_slice %11 {offsets = [0, 0], sizes = [8, 96], strides = [1, 1]} : vector<8x128xf32> to vector<8x96xf32>
    %13 = arith.negf %12 : vector<8x96xf32>
    %14 = math.exp %13 : vector<8x96xf32>
    %cst_15 = arith.constant 1.000000e+00 : f32
    %15 = vector.broadcast %cst_15 : f32 to vector<8x96xf32>
    %16 = arith.addf %15, %14 : vector<8x96xf32>
    %17 = arith.divf %15, %16 : vector<8x96xf32>
    %18 = vector.extract_strided_slice %17 {offsets = [0, 0], sizes = [8, 32], strides = [1, 1]} : vector<8x96xf32> to vector<8x32xf32>
    %19 = vector.extract_strided_slice %17 {offsets = [0, 32], sizes = [8, 32], strides = [1, 1]} : vector<8x96xf32> to vector<8x32xf32>
    %20 = vector.extract_strided_slice %17 {offsets = [0, 64], sizes = [8, 32], strides = [1, 1]} : vector<8x96xf32> to vector<8x32xf32>
    %21 = vector.extract_strided_slice %11 {offsets = [0, 96], sizes = [8, 32], strides = [1, 1]} : vector<8x128xf32> to vector<8x32xf32>
    %22 = math.tanh %21 : vector<8x32xf32>
    %23 = arith.mulf %19, %2 : vector<8x32xf32>
    %24 = arith.mulf %18, %22 : vector<8x32xf32>
    %25 = arith.addf %23, %24 : vector<8x32xf32>
    %26 = math.tanh %25 : vector<8x32xf32>
    %27 = arith.mulf %20, %26 : vector<8x32xf32>
    %c0_16 = arith.constant 0 : index
    %c16_17 = arith.constant 16 : index
    %28 = vector.load %arg8[%c0_16, %c16_17] : memref<8x48xf32, #tpu.memory_space<vmem>>, vector<8x32xf32>
    tpu.vector_store %arg8[%c0_16, %c16_17], %27 {strides = array<i32>} : memref<8x48xf32, #tpu.memory_space<vmem>>, vector<8x32xf32>,
    %c0_18 = arith.constant 0 : index
    %c1 = arith.constant 1 : index
    %c0_19 = arith.constant 0 : index
    %29 = vector.load %arg0[%c0_18, %c1, %c0_19] : memref<8x8x16xf32, #tpu.memory_space<vmem>>, vector<8x1x16xf32>
    %30 = vector.shape_cast %29 : vector<8x1x16xf32> to vector<8x16xf32>
    %c0_20 = arith.constant 0 : index
    %c0_21 = arith.constant 0 : index
    %31 = vector.load %arg8[%c0_20, %c0_21] : memref<8x48xf32, #tpu.memory_space<vmem>>, vector<8x16xf32>
    tpu.vector_store %arg8[%c0_20, %c0_21], %30 {strides = array<i32>} : memref<8x48xf32, #tpu.memory_space<vmem>>, vector<8x16xf32>,
    %c0_22 = arith.constant 0 : index
    %c0_23 = arith.constant 0 : index
    %32 = vector.load %arg8[%c0_22, %c0_23] : memref<8x48xf32, #tpu.memory_space<vmem>>, vector<8x48xf32>
    %c0_24 = arith.constant 0 : index
    %c0_25 = arith.constant 0 : index
    %33 = vector.load %arg3[%c0_24, %c0_25] : memref<48x128xf32, #tpu.memory_space<vmem>>, vector<48x128xf32>
    %cst_26 = arith.constant dense<0.000000e+00> : vector<8x128xf32>
    %34 = tpu.matmul %32, %33, %cst_26 {dimension_numbers = #tpu.dot_dimension_numbers<[1], [0], [0], [1], [0, 0, 1, 1], [], []>} : vector<8x48xf32>, vector<48x128xf32>, vector<8x128xf32> -> vector<8x128xf32>
    %35 = vector.broadcast %3 : vector<1x128xf32> to vector<8x128xf32>
    %36 = arith.addf %34, %35 : vector<8x128xf32>
    %37 = vector.extract_strided_slice %36 {offsets = [0, 0], sizes = [8, 96], strides = [1, 1]} : vector<8x128xf32> to vector<8x96xf32>
    %38 = arith.negf %37 : vector<8x96xf32>
    %39 = math.exp %38 : vector<8x96xf32>
    %cst_27 = arith.constant 1.000000e+00 : f32
    %40 = vector.broadcast %cst_27 : f32 to vector<8x96xf32>
    %41 = arith.addf %40, %39 : vector<8x96xf32>
    %42 = arith.divf %40, %41 : vector<8x96xf32>
    %43 = vector.extract_strided_slice %42 {offsets = [0, 0], sizes = [8, 32], strides = [1, 1]} : vector<8x96xf32> to vector<8x32xf32>
    %44 = vector.extract_strided_slice %42 {offsets = [0, 32], sizes = [8, 32], strides = [1, 1]} : vector<8x96xf32> to vector<8x32xf32>
    %45 = vector.extract_strided_slice %42 {offsets = [0, 64], sizes = [8, 32], strides = [1, 1]} : vector<8x96xf32> to vector<8x32xf32>
    %46 = vector.extract_strided_slice %36 {offsets = [0, 96], sizes = [8, 32], strides = [1, 1]} : vector<8x128xf32> to vector<8x32xf32>
    %47 = math.tanh %46 : vector<8x32xf32>
    %48 = arith.mulf %44, %25 : vector<8x32xf32>
    %49 = arith.mulf %43, %47 : vector<8x32xf32>
    %50 = arith.addf %48, %49 : vector<8x32xf32>
    %51 = math.tanh %50 : vector<8x32xf32>
    %52 = arith.mulf %45, %51 : vector<8x32xf32>
    %c0_28 = arith.constant 0 : index
    %c16_29 = arith.constant 16 : index
    %53 = vector.load %arg8[%c0_28, %c16_29] : memref<8x48xf32, #tpu.memory_space<vmem>>, vector<8x32xf32>
    tpu.vector_store %arg8[%c0_28, %c16_29], %52 {strides = array<i32>} : memref<8x48xf32, #tpu.memory_space<vmem>>, vector<8x32xf32>,
    %c0_30 = arith.constant 0 : index
    %c2 = arith.constant 2 : index
    %c0_31 = arith.constant 0 : index
    %54 = vector.load %arg0[%c0_30, %c2, %c0_31] : memref<8x8x16xf32, #tpu.memory_space<vmem>>, vector<8x1x16xf32>
    %55 = vector.shape_cast %54 : vector<8x1x16xf32> to vector<8x16xf32>
    %c0_32 = arith.constant 0 : index
    %c0_33 = arith.constant 0 : index
    %56 = vector.load %arg8[%c0_32, %c0_33] : memref<8x48xf32, #tpu.memory_space<vmem>>, vector<8x16xf32>
    tpu.vector_store %arg8[%c0_32, %c0_33], %55 {strides = array<i32>} : memref<8x48xf32, #tpu.memory_space<vmem>>, vector<8x16xf32>,
    %c0_34 = arith.constant 0 : index
    %c0_35 = arith.constant 0 : index
    %57 = vector.load %arg8[%c0_34, %c0_35] : memref<8x48xf32, #tpu.memory_space<vmem>>, vector<8x48xf32>
    %c0_36 = arith.constant 0 : index
    %c0_37 = arith.constant 0 : index
    %58 = vector.load %arg3[%c0_36, %c0_37] : memref<48x128xf32, #tpu.memory_space<vmem>>, vector<48x128xf32>
    %cst_38 = arith.constant dense<0.000000e+00> : vector<8x128xf32>
    %59 = tpu.matmul %57, %58, %cst_38 {dimension_numbers = #tpu.dot_dimension_numbers<[1], [0], [0], [1], [0, 0, 1, 1], [], []>} : vector<8x48xf32>, vector<48x128xf32>, vector<8x128xf32> -> vector<8x128xf32>
    %60 = vector.broadcast %3 : vector<1x128xf32> to vector<8x128xf32>
    %61 = arith.addf %59, %60 : vector<8x128xf32>
    %62 = vector.extract_strided_slice %61 {offsets = [0, 0], sizes = [8, 96], strides = [1, 1]} : vector<8x128xf32> to vector<8x96xf32>
    %63 = arith.negf %62 : vector<8x96xf32>
    %64 = math.exp %63 : vector<8x96xf32>
    %cst_39 = arith.constant 1.000000e+00 : f32
    %65 = vector.broadcast %cst_39 : f32 to vector<8x96xf32>
    %66 = arith.addf %65, %64 : vector<8x96xf32>
    %67 = arith.divf %65, %66 : vector<8x96xf32>
    %68 = vector.extract_strided_slice %67 {offsets = [0, 0], sizes = [8, 32], strides = [1, 1]} : vector<8x96xf32> to vector<8x32xf32>
    %69 = vector.extract_strided_slice %67 {offsets = [0, 32], sizes = [8, 32], strides = [1, 1]} : vector<8x96xf32> to vector<8x32xf32>
    %70 = vector.extract_strided_slice %67 {offsets = [0, 64], sizes = [8, 32], strides = [1, 1]} : vector<8x96xf32> to vector<8x32xf32>
    %71 = vector.extract_strided_slice %61 {offsets = [0, 96], sizes = [8, 32], strides = [1, 1]} : vector<8x128xf32> to vector<8x32xf32>
    %72 = math.tanh %71 : vector<8x32xf32>
    %73 = arith.mulf %69, %50 : vector<8x32xf32>
    %74 = arith.mulf %68, %72 : vector<8x32xf32>
    %75 = arith.addf %73, %74 : vector<8x32xf32>
    %76 = math.tanh %75 : vector<8x32xf32>
    %77 = arith.mulf %70, %76 : vector<8x32xf32>
    %c0_40 = arith.constant 0 : index
    %c16_41 = arith.constant 16 : index
    %78 = vector.load %arg8[%c0_40, %c16_41] : memref<8x48xf32, #tpu.memory_space<vmem>>, vector<8x32xf32>
    tpu.vector_store %arg8[%c0_40, %c16_41], %77 {strides = array<i32>} : memref<8x48xf32, #tpu.memory_space<vmem>>, vector<8x32xf32>,
    %c0_42 = arith.constant 0 : index
    %c3 = arith.constant 3 : index
    %c0_43 = arith.constant 0 : index
    %79 = vector.load %arg0[%c0_42, %c3, %c0_43] : memref<8x8x16xf32, #tpu.memory_space<vmem>>, vector<8x1x16xf32>
    %80 = vector.shape_cast %79 : vector<8x1x16xf32> to vector<8x16xf32>
    %c0_44 = arith.constant 0 : index
    %c0_45 = arith.constant 0 : index
    %81 = vector.load %arg8[%c0_44, %c0_45] : memref<8x48xf32, #tpu.memory_space<vmem>>, vector<8x16xf32>
    tpu.vector_store %arg8[%c0_44, %c0_45], %80 {strides = array<i32>} : memref<8x48xf32, #tpu.memory_space<vmem>>, vector<8x16xf32>,
    %c0_46 = arith.constant 0 : index
    %c0_47 = arith.constant 0 : index
    %82 = vector.load %arg8[%c0_46, %c0_47] : memref<8x48xf32, #tpu.memory_space<vmem>>, vector<8x48xf32>
    %c0_48 = arith.constant 0 : index
    %c0_49 = arith.constant 0 : index
    %83 = vector.load %arg3[%c0_48, %c0_49] : memref<48x128xf32, #tpu.memory_space<vmem>>, vector<48x128xf32>
    %cst_50 = arith.constant dense<0.000000e+00> : vector<8x128xf32>
    %84 = tpu.matmul %82, %83, %cst_50 {dimension_numbers = #tpu.dot_dimension_numbers<[1], [0], [0], [1], [0, 0, 1, 1], [], []>} : vector<8x48xf32>, vector<48x128xf32>, vector<8x128xf32> -> vector<8x128xf32>
    %85 = vector.broadcast %3 : vector<1x128xf32> to vector<8x128xf32>
    %86 = arith.addf %84, %85 : vector<8x128xf32>
    %87 = vector.extract_strided_slice %86 {offsets = [0, 0], sizes = [8, 96], strides = [1, 1]} : vector<8x128xf32> to vector<8x96xf32>
    %88 = arith.negf %87 : vector<8x96xf32>
    %89 = math.exp %88 : vector<8x96xf32>
    %cst_51 = arith.constant 1.000000e+00 : f32
    %90 = vector.broadcast %cst_51 : f32 to vector<8x96xf32>
    %91 = arith.addf %90, %89 : vector<8x96xf32>
    %92 = arith.divf %90, %91 : vector<8x96xf32>
    %93 = vector.extract_strided_slice %92 {offsets = [0, 0], sizes = [8, 32], strides = [1, 1]} : vector<8x96xf32> to vector<8x32xf32>
    %94 = vector.extract_strided_slice %92 {offsets = [0, 32], sizes = [8, 32], strides = [1, 1]} : vector<8x96xf32> to vector<8x32xf32>
    %95 = vector.extract_strided_slice %92 {offsets = [0, 64], sizes = [8, 32], strides = [1, 1]} : vector<8x96xf32> to vector<8x32xf32>
    %96 = vector.extract_strided_slice %86 {offsets = [0, 96], sizes = [8, 32], strides = [1, 1]} : vector<8x128xf32> to vector<8x32xf32>
    %97 = math.tanh %96 : vector<8x32xf32>
    %98 = arith.mulf %94, %75 : vector<8x32xf32>
    %99 = arith.mulf %93, %97 : vector<8x32xf32>
    %100 = arith.addf %98, %99 : vector<8x32xf32>
    %101 = math.tanh %100 : vector<8x32xf32>
    %102 = arith.mulf %95, %101 : vector<8x32xf32>
    %c0_52 = arith.constant 0 : index
    %c16_53 = arith.constant 16 : index
    %103 = vector.load %arg8[%c0_52, %c16_53] : memref<8x48xf32, #tpu.memory_space<vmem>>, vector<8x32xf32>
    tpu.vector_store %arg8[%c0_52, %c16_53], %102 {strides = array<i32>} : memref<8x48xf32, #tpu.memory_space<vmem>>, vector<8x32xf32>,
    %c0_54 = arith.constant 0 : index
    %c4 = arith.constant 4 : index
    %c0_55 = arith.constant 0 : index
    %104 = vector.load %arg0[%c0_54, %c4, %c0_55] : memref<8x8x16xf32, #tpu.memory_space<vmem>>, vector<8x1x16xf32>
    %105 = vector.shape_cast %104 : vector<8x1x16xf32> to vector<8x16xf32>
    %c0_56 = arith.constant 0 : index
    %c0_57 = arith.constant 0 : index
    %106 = vector.load %arg8[%c0_56, %c0_57] : memref<8x48xf32, #tpu.memory_space<vmem>>, vector<8x16xf32>
    tpu.vector_store %arg8[%c0_56, %c0_57], %105 {strides = array<i32>} : memref<8x48xf32, #tpu.memory_space<vmem>>, vector<8x16xf32>,
    %c0_58 = arith.constant 0 : index
    %c0_59 = arith.constant 0 : index
    %107 = vector.load %arg8[%c0_58, %c0_59] : memref<8x48xf32, #tpu.memory_space<vmem>>, vector<8x48xf32>
    %c0_60 = arith.constant 0 : index
    %c0_61 = arith.constant 0 : index
    %108 = vector.load %arg3[%c0_60, %c0_61] : memref<48x128xf32, #tpu.memory_space<vmem>>, vector<48x128xf32>
    %cst_62 = arith.constant dense<0.000000e+00> : vector<8x128xf32>
    %109 = tpu.matmul %107, %108, %cst_62 {dimension_numbers = #tpu.dot_dimension_numbers<[1], [0], [0], [1], [0, 0, 1, 1], [], []>} : vector<8x48xf32>, vector<48x128xf32>, vector<8x128xf32> -> vector<8x128xf32>
    %110 = vector.broadcast %3 : vector<1x128xf32> to vector<8x128xf32>
    %111 = arith.addf %109, %110 : vector<8x128xf32>
    %112 = vector.extract_strided_slice %111 {offsets = [0, 0], sizes = [8, 96], strides = [1, 1]} : vector<8x128xf32> to vector<8x96xf32>
    %113 = arith.negf %112 : vector<8x96xf32>
    %114 = math.exp %113 : vector<8x96xf32>
    %cst_63 = arith.constant 1.000000e+00 : f32
    %115 = vector.broadcast %cst_63 : f32 to vector<8x96xf32>
    %116 = arith.addf %115, %114 : vector<8x96xf32>
    %117 = arith.divf %115, %116 : vector<8x96xf32>
    %118 = vector.extract_strided_slice %117 {offsets = [0, 0], sizes = [8, 32], strides = [1, 1]} : vector<8x96xf32> to vector<8x32xf32>
    %119 = vector.extract_strided_slice %117 {offsets = [0, 32], sizes = [8, 32], strides = [1, 1]} : vector<8x96xf32> to vector<8x32xf32>
    %120 = vector.extract_strided_slice %117 {offsets = [0, 64], sizes = [8, 32], strides = [1, 1]} : vector<8x96xf32> to vector<8x32xf32>
    %121 = vector.extract_strided_slice %111 {offsets = [0, 96], sizes = [8, 32], strides = [1, 1]} : vector<8x128xf32> to vector<8x32xf32>
    %122 = math.tanh %121 : vector<8x32xf32>
    %123 = arith.mulf %119, %100 : vector<8x32xf32>
    %124 = arith.mulf %118, %122 : vector<8x32xf32>
    %125 = arith.addf %123, %124 : vector<8x32xf32>
    %126 = math.tanh %125 : vector<8x32xf32>
    %127 = arith.mulf %120, %126 : vector<8x32xf32>
    %c0_64 = arith.constant 0 : index
    %c16_65 = arith.constant 16 : index
    %128 = vector.load %arg8[%c0_64, %c16_65] : memref<8x48xf32, #tpu.memory_space<vmem>>, vector<8x32xf32>
    tpu.vector_store %arg8[%c0_64, %c16_65], %127 {strides = array<i32>} : memref<8x48xf32, #tpu.memory_space<vmem>>, vector<8x32xf32>,
    %c0_66 = arith.constant 0 : index
    %c5 = arith.constant 5 : index
    %c0_67 = arith.constant 0 : index
    %129 = vector.load %arg0[%c0_66, %c5, %c0_67] : memref<8x8x16xf32, #tpu.memory_space<vmem>>, vector<8x1x16xf32>
    %130 = vector.shape_cast %129 : vector<8x1x16xf32> to vector<8x16xf32>
    %c0_68 = arith.constant 0 : index
    %c0_69 = arith.constant 0 : index
    %131 = vector.load %arg8[%c0_68, %c0_69] : memref<8x48xf32, #tpu.memory_space<vmem>>, vector<8x16xf32>
    tpu.vector_store %arg8[%c0_68, %c0_69], %130 {strides = array<i32>} : memref<8x48xf32, #tpu.memory_space<vmem>>, vector<8x16xf32>,
    %c0_70 = arith.constant 0 : index
    %c0_71 = arith.constant 0 : index
    %132 = vector.load %arg8[%c0_70, %c0_71] : memref<8x48xf32, #tpu.memory_space<vmem>>, vector<8x48xf32>
    %c0_72 = arith.constant 0 : index
    %c0_73 = arith.constant 0 : index
    %133 = vector.load %arg3[%c0_72, %c0_73] : memref<48x128xf32, #tpu.memory_space<vmem>>, vector<48x128xf32>
    %cst_74 = arith.constant dense<0.000000e+00> : vector<8x128xf32>
    %134 = tpu.matmul %132, %133, %cst_74 {dimension_numbers = #tpu.dot_dimension_numbers<[1], [0], [0], [1], [0, 0, 1, 1], [], []>} : vector<8x48xf32>, vector<48x128xf32>, vector<8x128xf32> -> vector<8x128xf32>
    %135 = vector.broadcast %3 : vector<1x128xf32> to vector<8x128xf32>
    %136 = arith.addf %134, %135 : vector<8x128xf32>
    %137 = vector.extract_strided_slice %136 {offsets = [0, 0], sizes = [8, 96], strides = [1, 1]} : vector<8x128xf32> to vector<8x96xf32>
    %138 = arith.negf %137 : vector<8x96xf32>
    %139 = math.exp %138 : vector<8x96xf32>
    %cst_75 = arith.constant 1.000000e+00 : f32
    %140 = vector.broadcast %cst_75 : f32 to vector<8x96xf32>
    %141 = arith.addf %140, %139 : vector<8x96xf32>
    %142 = arith.divf %140, %141 : vector<8x96xf32>
    %143 = vector.extract_strided_slice %142 {offsets = [0, 0], sizes = [8, 32], strides = [1, 1]} : vector<8x96xf32> to vector<8x32xf32>
    %144 = vector.extract_strided_slice %142 {offsets = [0, 32], sizes = [8, 32], strides = [1, 1]} : vector<8x96xf32> to vector<8x32xf32>
    %145 = vector.extract_strided_slice %142 {offsets = [0, 64], sizes = [8, 32], strides = [1, 1]} : vector<8x96xf32> to vector<8x32xf32>
    %146 = vector.extract_strided_slice %136 {offsets = [0, 96], sizes = [8, 32], strides = [1, 1]} : vector<8x128xf32> to vector<8x32xf32>
    %147 = math.tanh %146 : vector<8x32xf32>
    %148 = arith.mulf %144, %125 : vector<8x32xf32>
    %149 = arith.mulf %143, %147 : vector<8x32xf32>
    %150 = arith.addf %148, %149 : vector<8x32xf32>
    %151 = math.tanh %150 : vector<8x32xf32>
    %152 = arith.mulf %145, %151 : vector<8x32xf32>
    %c0_76 = arith.constant 0 : index
    %c16_77 = arith.constant 16 : index
    %153 = vector.load %arg8[%c0_76, %c16_77] : memref<8x48xf32, #tpu.memory_space<vmem>>, vector<8x32xf32>
    tpu.vector_store %arg8[%c0_76, %c16_77], %152 {strides = array<i32>} : memref<8x48xf32, #tpu.memory_space<vmem>>, vector<8x32xf32>,
    %c0_78 = arith.constant 0 : index
    %c6 = arith.constant 6 : index
    %c0_79 = arith.constant 0 : index
    %154 = vector.load %arg0[%c0_78, %c6, %c0_79] : memref<8x8x16xf32, #tpu.memory_space<vmem>>, vector<8x1x16xf32>
    %155 = vector.shape_cast %154 : vector<8x1x16xf32> to vector<8x16xf32>
    %c0_80 = arith.constant 0 : index
    %c0_81 = arith.constant 0 : index
    %156 = vector.load %arg8[%c0_80, %c0_81] : memref<8x48xf32, #tpu.memory_space<vmem>>, vector<8x16xf32>
    tpu.vector_store %arg8[%c0_80, %c0_81], %155 {strides = array<i32>} : memref<8x48xf32, #tpu.memory_space<vmem>>, vector<8x16xf32>,
    %c0_82 = arith.constant 0 : index
    %c0_83 = arith.constant 0 : index
    %157 = vector.load %arg8[%c0_82, %c0_83] : memref<8x48xf32, #tpu.memory_space<vmem>>, vector<8x48xf32>
    %c0_84 = arith.constant 0 : index
    %c0_85 = arith.constant 0 : index
    %158 = vector.load %arg3[%c0_84, %c0_85] : memref<48x128xf32, #tpu.memory_space<vmem>>, vector<48x128xf32>
    %cst_86 = arith.constant dense<0.000000e+00> : vector<8x128xf32>
    %159 = tpu.matmul %157, %158, %cst_86 {dimension_numbers = #tpu.dot_dimension_numbers<[1], [0], [0], [1], [0, 0, 1, 1], [], []>} : vector<8x48xf32>, vector<48x128xf32>, vector<8x128xf32> -> vector<8x128xf32>
    %160 = vector.broadcast %3 : vector<1x128xf32> to vector<8x128xf32>
    %161 = arith.addf %159, %160 : vector<8x128xf32>
    %162 = vector.extract_strided_slice %161 {offsets = [0, 0], sizes = [8, 96], strides = [1, 1]} : vector<8x128xf32> to vector<8x96xf32>
    %163 = arith.negf %162 : vector<8x96xf32>
    %164 = math.exp %163 : vector<8x96xf32>
    %cst_87 = arith.constant 1.000000e+00 : f32
    %165 = vector.broadcast %cst_87 : f32 to vector<8x96xf32>
    %166 = arith.addf %165, %164 : vector<8x96xf32>
    %167 = arith.divf %165, %166 : vector<8x96xf32>
    %168 = vector.extract_strided_slice %167 {offsets = [0, 0], sizes = [8, 32], strides = [1, 1]} : vector<8x96xf32> to vector<8x32xf32>
    %169 = vector.extract_strided_slice %167 {offsets = [0, 32], sizes = [8, 32], strides = [1, 1]} : vector<8x96xf32> to vector<8x32xf32>
    %170 = vector.extract_strided_slice %167 {offsets = [0, 64], sizes = [8, 32], strides = [1, 1]} : vector<8x96xf32> to vector<8x32xf32>
    %171 = vector.extract_strided_slice %161 {offsets = [0, 96], sizes = [8, 32], strides = [1, 1]} : vector<8x128xf32> to vector<8x32xf32>
    %172 = math.tanh %171 : vector<8x32xf32>
    %173 = arith.mulf %169, %150 : vector<8x32xf32>
    %174 = arith.mulf %168, %172 : vector<8x32xf32>
    %175 = arith.addf %173, %174 : vector<8x32xf32>
    %176 = math.tanh %175 : vector<8x32xf32>
    %177 = arith.mulf %170, %176 : vector<8x32xf32>
    %c0_88 = arith.constant 0 : index
    %c16_89 = arith.constant 16 : index
    %178 = vector.load %arg8[%c0_88, %c16_89] : memref<8x48xf32, #tpu.memory_space<vmem>>, vector<8x32xf32>
    tpu.vector_store %arg8[%c0_88, %c16_89], %177 {strides = array<i32>} : memref<8x48xf32, #tpu.memory_space<vmem>>, vector<8x32xf32>,
    %c0_90 = arith.constant 0 : index
    %c7 = arith.constant 7 : index
    %c0_91 = arith.constant 0 : index
    %179 = vector.load %arg0[%c0_90, %c7, %c0_91] : memref<8x8x16xf32, #tpu.memory_space<vmem>>, vector<8x1x16xf32>
    %180 = vector.shape_cast %179 : vector<8x1x16xf32> to vector<8x16xf32>
    %c0_92 = arith.constant 0 : index
    %c0_93 = arith.constant 0 : index
    %181 = vector.load %arg8[%c0_92, %c0_93] : memref<8x48xf32, #tpu.memory_space<vmem>>, vector<8x16xf32>
    tpu.vector_store %arg8[%c0_92, %c0_93], %180 {strides = array<i32>} : memref<8x48xf32, #tpu.memory_space<vmem>>, vector<8x16xf32>,
    %c0_94 = arith.constant 0 : index
    %c0_95 = arith.constant 0 : index
    %182 = vector.load %arg8[%c0_94, %c0_95] : memref<8x48xf32, #tpu.memory_space<vmem>>, vector<8x48xf32>
    %c0_96 = arith.constant 0 : index
    %c0_97 = arith.constant 0 : index
    %183 = vector.load %arg3[%c0_96, %c0_97] : memref<48x128xf32, #tpu.memory_space<vmem>>, vector<48x128xf32>
    %cst_98 = arith.constant dense<0.000000e+00> : vector<8x128xf32>
    %184 = tpu.matmul %182, %183, %cst_98 {dimension_numbers = #tpu.dot_dimension_numbers<[1], [0], [0], [1], [0, 0, 1, 1], [], []>} : vector<8x48xf32>, vector<48x128xf32>, vector<8x128xf32> -> vector<8x128xf32>
    %185 = vector.broadcast %3 : vector<1x128xf32> to vector<8x128xf32>
    %186 = arith.addf %184, %185 : vector<8x128xf32>
    %187 = vector.extract_strided_slice %186 {offsets = [0, 0], sizes = [8, 96], strides = [1, 1]} : vector<8x128xf32> to vector<8x96xf32>
    %188 = arith.negf %187 : vector<8x96xf32>
    %189 = math.exp %188 : vector<8x96xf32>
    %cst_99 = arith.constant 1.000000e+00 : f32
    %190 = vector.broadcast %cst_99 : f32 to vector<8x96xf32>
    %191 = arith.addf %190, %189 : vector<8x96xf32>
    %192 = arith.divf %190, %191 : vector<8x96xf32>
    %193 = vector.extract_strided_slice %192 {offsets = [0, 0], sizes = [8, 32], strides = [1, 1]} : vector<8x96xf32> to vector<8x32xf32>
    %194 = vector.extract_strided_slice %192 {offsets = [0, 32], sizes = [8, 32], strides = [1, 1]} : vector<8x96xf32> to vector<8x32xf32>
    %195 = vector.extract_strided_slice %192 {offsets = [0, 64], sizes = [8, 32], strides = [1, 1]} : vector<8x96xf32> to vector<8x32xf32>
    %196 = vector.extract_strided_slice %186 {offsets = [0, 96], sizes = [8, 32], strides = [1, 1]} : vector<8x128xf32> to vector<8x32xf32>
    %197 = math.tanh %196 : vector<8x32xf32>
    %198 = arith.mulf %194, %175 : vector<8x32xf32>
    %199 = arith.mulf %193, %197 : vector<8x32xf32>
    %200 = arith.addf %198, %199 : vector<8x32xf32>
    %201 = math.tanh %200 : vector<8x32xf32>
    %202 = arith.mulf %195, %201 : vector<8x32xf32>
    %c0_100 = arith.constant 0 : index
    %c16_101 = arith.constant 16 : index
    %203 = vector.load %arg8[%c0_100, %c16_101] : memref<8x48xf32, #tpu.memory_space<vmem>>, vector<8x32xf32>
    tpu.vector_store %arg8[%c0_100, %c16_101], %202 {strides = array<i32>} : memref<8x48xf32, #tpu.memory_space<vmem>>, vector<8x32xf32>,
    %c0_102 = arith.constant 0 : index
    %c0_103 = arith.constant 0 : index
    %204 = vector.load %arg5[%c0_102, %c0_103] : memref<32x128xf32, #tpu.memory_space<vmem>>, vector<32x128xf32>
    %cst_104 = arith.constant dense<0.000000e+00> : vector<8x128xf32>
    %205 = tpu.matmul %202, %204, %cst_104 {dimension_numbers = #tpu.dot_dimension_numbers<[1], [0], [0], [1], [0, 0, 1, 1], [], []>} : vector<8x32xf32>, vector<32x128xf32>, vector<8x128xf32> -> vector<8x128xf32>
    %c0_105 = arith.constant 0 : index
    %c0_106 = arith.constant 0 : index
    %206 = vector.load %arg6[%c0_105, %c0_106] : memref<1x128xf32, #tpu.memory_space<vmem>>, vector<1x128xf32>
    %207 = vector.broadcast %206 : vector<1x128xf32> to vector<8x128xf32>
    %208 = arith.addf %205, %207 : vector<8x128xf32>
    %c0_107 = arith.constant 0 : index
    %c0_108 = arith.constant 0 : index
    %209 = vector.load %arg7[%c0_107, %c0_108] : memref<8x128xf32, #tpu.memory_space<vmem>>, vector<8x128xf32>
    tpu.vector_store %arg7[%c0_107, %c0_108], %208 {strides = array<i32>} : memref<8x128xf32, #tpu.memory_space<vmem>>, vector<8x128xf32>,
    return
  }
}

</mosaic_0001>

<bundles_post_ra>
// kernel: bayes_lstm_forward.1
= control target key start
LH: loop header
LB: loop body
LE: loop exit
PB: predicated region body
PF: predicated region fallthrough
CT: control target
= control target key end

     0   :  { %s1008_s28 = smov 16   ;;  %vm52_vm0 = vcmask 1041409   ;;  %s1009_s23 = smov 32   ;;  %vm55_vm1 = vcmask 1042434   ;;  %vm58_vm2 = vcmask 1043459   ;;  %vm61_vm3 = vcmask 1044484   ;;  %s1470_s1 = inlined_call_operand.vmem [shape: f32[8,32], index: 1, kind: input, shape index: {}]   ;;  %s1471_s3 = inlined_call_operand.vmem [shape: f32[48,128], index: 3, kind: input, shape index: {}]   ;;  %s1472_s4 = inlined_call_operand.vmem [shape: f32[1,128], index: 4, kind: input, shape index: {}]   ;;  %s1473_s0 = inlined_call_operand.vmem [shape: f32[8,8,16], index: 0, kind: input, shape index: {}]   ;;  %s1474_s2 = inlined_call_operand.vmem [shape: f32[8,32], index: 2, kind: input, shape index: {}]   ;;  %s1475_s5 = inlined_call_operand.vmem [shape: f32[32,128], index: 5, kind: input, shape index: {}]   ;;  %s1476_s6 = inlined_call_operand.vmem [shape: f32[1,128], index: 6, kind: input, shape index: {}]   ;;  %s1477_s7 = inlined_call_operand.vmem [shape: f32[8,128], index: 7, kind: output, shape index: {}]  }
   0x1   :  { %v26_v0 = vld [vmem:[%s1470_s1] sm:$0xff]  ;;  %v81_v1 = vld [vmem:[%s1471_s3 + $0x28] sm:$0xff]  ;;  %v1068_v3 = vld [vmem:[%s1471_s3 + $0x18] sm:$0xff]  ;;  %vm64_vm4 = vcmask 1045509   ;;  %vm67_vm5 = vcmask 1046534   ;;  %vm70_vm6 = vcmask 1047559  }
   0x2   :  { %28 = vrot.lane.b32.xlu0 %v26_v0, %s1008_s28  ;;  %99 = vmatpush.msra.mxu0 %v81_v1  ;;  %v1061_v2 = vld [vmem:[%s1471_s3 + $0x20] sm:$0xff]  ;;  %v1073_v4 = vld [vmem:[%s1471_s3 + $0x10] sm:$0xff]  ;;  %v1082_v5 = vld [vmem:[%s1471_s3 + $0x8] sm:$0xff]  ;;  %vm31_vm7 = vcmask 392320   ;;  %vm73_vm8 = vcmask 130048   ;;  %vm85_vm9 = vcmask 392192  }
   0x3   :  { %207 = vmatpush.msra.mxu1 %v81_v1  ;;  %311 = vmatpush.msra.mxu2 %v81_v1  ;;  %v36_v6 = vld [vmem:[%s1473_s0 + $0x8] sm:$0x1]  ;;  %v1094_v7 = vld [vmem:[%s1471_s3] sm:$0xff]  ;;  %v37_v8 = vld [vmem:[%s1473_s0 + $0x10] sm:$0x1] }
   0x4   :  { %415 = vmatpush.msra.mxu3 %v81_v1  ;;  %100 = vmatpush.msra.mxu0 %v1061_v2  ;;  %v51_v9 = vrot.slane %v36_v6, 7  ;;  %v35_v10 = vld [vmem:[%s1473_s0] sm:$0x1]  ;;  %v38_v12 = vld [vmem:[%s1473_s0 + $0x18] sm:$0x1]  ;;  %v54_v13 = vrot.slane %v37_v8, 6 }
   0x5   :  { %208 = vmatpush.msra.mxu1 %v1061_v2  ;;  %312 = vmatpush.msra.mxu2 %v1061_v2  ;;  %v33_v11 = vld [vmem:[%s1474_s2] sm:$0xff]  ;;  %v57_v16 = vrot.slane %v38_v12, 5  ;;  %v40_v18 = vld [vmem:[%s1473_s0 + $0x28] sm:$0x1]  ;;  %v41_v21 = vld [vmem:[%s1473_s0 + $0x30] sm:$0x1] }
   0x6   :  { %416 = vmatpush.msra.mxu3 %v1061_v2  ;;  %101 = vmatpush.msra.mxu0 %v1068_v3  ;;  %v53_v14 = vsel %vm52_vm0, %v51_v9, %v35_v10  ;;  %v39_v15 = vld [vmem:[%s1473_s0 + $0x20] sm:$0x1]  ;;  %v63_v22 = vrot.slane %v40_v18, 3  ;;  %v42_v24 = vld [vmem:[%s1473_s0 + $0x38] sm:$0x1]  ;;  %v66_v25 = vrot.slane %v41_v21, 2 }
   0x7   :  { %209 = vmatpush.msra.mxu1 %v1068_v3  ;;  %313 = vmatpush.msra.mxu2 %v1068_v3  ;;  %v56_v17 = vsel %vm55_vm1, %v54_v13, %v53_v14  ;;  %v60_v19 = vrot.slane %v39_v15, 4  ;;  %v69_v27 = vrot.slane %v42_v24, 1  ;;  %v1159_v32 = vld [vmem:[%s1472_s4] ss:$0 sm:$0xff]  ;;  %s1010_s4 = smov 80  }
   0x8   :  { %417 = vmatpush.msra.mxu3 %v1068_v3  ;;  %102 = vmatpush.msra.mxu0 %v1073_v4  ;;  %v59_v20 = vsel %vm58_vm2, %v57_v16, %v56_v17  ;;  %v156_v58 = vld [vmem:[%s1473_s0 + $0x9] sm:$0x1]  ;;  %v157_v59 = vld [vmem:[%s1473_s0 + $0x11] sm:$0x1]  ;;  %v155_v61 = vld [vmem:[%s1473_s0 + $0x1] sm:$0x1] }
   0x9   :  { %210 = vmatpush.msra.mxu1 %v1073_v4  ;;  %314 = vmatpush.msra.mxu2 %v1073_v4  ;;  %v62_v23 = vsel %vm61_vm3, %v60_v19, %v59_v20  ;;  %v171_v60 = vrot.slane %v156_v58, 7  ;;  %v158_v62 = vld [vmem:[%s1473_s0 + $0x19] sm:$0x1]  ;;  %v173_v63 = vrot.slane %v157_v59, 6  ;;  %v160_v9 = vld [vmem:[%s1473_s0 + $0x29] sm:$0x1] }
   0xa   :  { %418 = vmatpush.msra.mxu3 %v1073_v4  ;;  %103 = vmatpush.msra.mxu0 %v1082_v5  ;;  %v65_v26 = vsel %vm64_vm4, %v63_v22, %v62_v23  ;;  %v175_v6 = vrot.slane %v158_v62, 5  ;;  %v161_v12 = vld [vmem:[%s1473_s0 + $0x31] sm:$0x1]  ;;  %v179_v13 = vrot.slane %v160_v9, 3  ;;  %v162_v15 = vld [vmem:[%s1473_s0 + $0x39] sm:$0x1] }
   0xb   :  { %211 = vmatpush.msra.mxu1 %v1082_v5  ;;  %315 = vmatpush.msra.mxu2 %v1082_v5  ;;  %v68_v28 = vsel %vm67_vm5, %v66_v25, %v65_v26  ;;  %v172_v0 = vsel %vm52_vm0, %v171_v60, %v155_v61  ;;  %v181_v16 = vrot.slane %v161_v12, 2  ;;  %v183_v18 = vrot.slane %v162_v15, 1  ;;  %v264_v58 = vld [vmem:[%s1473_s0 + $0x2a] sm:$0x1]  ;;  %v265_v61 = vld [vmem:[%s1473_s0 + $0x32] sm:$0x1] }
   0xc   :  { %419 = vmatpush.msra.mxu3 %v1082_v5  ;;  %104 = vmatpush.msra.mxu0 %v1094_v7  ;;  %v71_v29 = vsel %vm70_vm6, %v69_v27, %v68_v28  ;;  %v174_v8 = vsel %vm55_vm1, %v173_v63, %v172_v0  ;;  %v283_v62 = vrot.slane %v264_v58, 3  ;;  %v266_v0 = vld [vmem:[%s1473_s0 + $0x3a] sm:$0x1] }
   0xd   :  { %212 = vmatpush.msra.mxu1 %v1094_v7  ;;  %316 = vmatpush.msra.mxu2 %v1094_v7 }
   0xe   :  { %420 = vmatpush.msra.mxu3 %v1094_v7  ;;  %130 = vrot.lane.b32.xlu1 %v33_v11, %s1009_s23  ;;  %v176_v11 = vsel %vm58_vm2, %v175_v6, %v174_v8  ;;  %v287_v8 = vrot.slane %v266_v0, 1 }
   0xf   :  { %519 = vmatpush.msrb.mxu0 %v81_v1  ;;  %623 = vmatpush.msrb.mxu1 %v81_v1 }
  0x10   :  { %727 = vmatpush.msrb.mxu2 %v81_v1  ;;  %v159_v1 = vld [vmem:[%s1473_s0 + $0x21] sm:$0x1] }
  0x11   :  { %520 = vmatpush.msrb.mxu0 %v1061_v2  ;;  %624 = vmatpush.msrb.mxu1 %v1061_v2  ;;  %v177_v10 = vrot.slane %v159_v1, 4  ;;  %v285_v1 = vrot.slane %v265_v61, 2 }
  0x12   :  { %728 = vmatpush.msrb.mxu2 %v1061_v2 }
  0x13   :  { %521 = vmatpush.msrb.mxu0 %v1068_v3  ;;  %625 = vmatpush.msrb.mxu1 %v1068_v3  ;;  %v178_v14 = vsel %vm61_vm3, %v177_v10, %v176_v11 }
  0x14   :  { %729 = vmatpush.msrb.mxu2 %v1068_v3  ;;  %v180_v17 = vsel %vm64_vm4, %v179_v13, %v178_v14 }
  0x15   :  { %522 = vmatpush.msrb.mxu0 %v1073_v4  ;;  %626 = vmatpush.msrb.mxu1 %v1073_v4  ;;  %v182_v19 = vsel %vm67_vm5, %v181_v16, %v180_v17 }
  0x16   :  { %730 = vmatpush.msrb.mxu2 %v1073_v4  ;;  %v184_v20 = vsel %vm70_vm6, %v183_v18, %v182_v19 }
  0x17   :  { %523 = vmatpush.msrb.mxu0 %v1082_v5  ;;  %627 = vmatpush.msrb.mxu1 %v1082_v5 }
  0x18   :  { %731 = vmatpush.msrb.mxu2 %v1082_v5 }
  0x19   :  { %524 = vmatpush.msrb.mxu0 %v1094_v7  ;;  %628 = vmatpush.msrb.mxu1 %v1094_v7 }
  0x1a   :  { %732 = vmatpush.msrb.mxu2 %v1094_v7 }
  0x74   :  { %v29_v30 = vpop.permute.xlu0 %28 }
  0x75   :  { %32 = vst.msk [vmem:[#allocation2] sm:$0xff] %vm31_vm7, %v29_v30 }
  0x76   :  { %74 = vst.msk [vmem:[#allocation2] sm:$0xff] %vm73_vm8, %v71_v29 }
  0x7d   :  { %v75_v31 = vld [vmem:[#allocation2] sm:$0xff] }
  0x7e   :  { %921 = vmatmul.msk.f32.vlgmr.msra.gmra.mxu0 %vm85_vm9, %v75_v31 }
  0x80   :  { %v131_v51 = vpop.permute.xlu1 %130 }
  0xfb   :  { %v106_v33 = vpop.f32.mrf.mxu0 }
  0xfc   :  { %v107_v34 = vadd.f32 %v1159_v32, %v106_v33 }
  0xfe   :  { %944 = vtanh.f32 %v107_v34  ;;  %v922_v36 = vmul.f32 -1.442695, %v107_v34 }
 0x100   :  { %946 = vpow2.f32 %v922_v36 }
 0x104   :  { %v945_v35 = vpop.eup %944 }
 0x105   :  { %135 = vrot.lane.b32.xlu0 %v945_v35, %s1009_s23 }
 0x106   :  { %v947_v37 = vpop.eup %946 }
 0x107   :  { %v112_v38 = vadd.f32 1.0, %v947_v37 }
 0x109   :  { %948 = vrcp.f32 %v112_v38  ;;  %v124_v44 = vand.u32 2147483648, %v112_v38  ;;  %vm118_vm11 = vweird.f32 %v112_v38  ;;  %v122_v45 = vand.u32 2147483647, %v112_v38 }
 0x10b   :  { %v125_v47 = vor.u32 1.1754944e-38, %v124_v44  ;;  %vm123_vm13 = vcmp.eq.f32.partialorder %v122_v45, 8.507059e+37 }
 0x10f   :  { %v949_v39 = vpop.eup %948 }
 0x110   :  { %v114_v40 = vmul.f32 %v949_v39, %v112_v38  ;;  %vm119_vm10 = vweird.f32 %v949_v39 }
 0x111   :  { %vm120_vm12 = vmor %vm118_vm11, %vm119_vm10 }
 0x112   :  { %v115_v41 = vsub.f32 1.0, %v114_v40 }
 0x114   :  { %v116_v42 = vmul.f32 %v949_v39, %v115_v41 }
 0x116   :  { %v117_v43 = vadd.f32 %v949_v39, %v116_v42 }
 0x118   :  { %v121_v46 = vsel %vm120_vm12, %v949_v39, %v117_v43 }
 0x119   :  { %v126_v48 = vsel %vm123_vm13, %v125_v47, %v121_v46 }
 0x11a   :  { %v133_v52 = vmul.f32 %v131_v51, %v126_v48  ;;  %v259_v51 = vld [vmem:[%s1473_s0 + $0x2] sm:$0x1] }
 0x177   :  { %v136_v49 = vpop.permute.xlu0 %135 }
 0x178   :  { %v138_v50 = vmul.f32 %v136_v49, %v126_v48  ;;  %v261_v49 = vld [vmem:[%s1473_s0 + $0x12] sm:$0x1] }
 0x17a   :  { %140 = vrot.lane.b32.xlu1 %v138_v50, %s1009_s23 }
 0x1ec   :  { %v141_v53 = vpop.permute.xlu1 %140 }
 0x1ed   :  { %v143_v54 = vadd.f32 %v141_v53, %v133_v52  ;;  %v262_v52 = vld [vmem:[%s1473_s0 + $0x1a] sm:$0x1]  ;;  %v277_v53 = vrot.slane %v261_v49, 6 }
 0x1ef   :  { %950 = vtanh.f32 %v143_v54 }
 0x1f5   :  { %v951_v55 = vpop.eup %950 }
 0x1f6   :  { %146 = vrot.lane.b32.xlu2 %v951_v55, %s1009_s23  ;;  %v263_v55 = vld [vmem:[%s1473_s0 + $0x22] sm:$0x1] }
 0x1f7   :  { %v281_v59 = vrot.slane %v263_v55, 4 }
 0x250   :  { %v147_v56 = vpop.permute.xlu2 %146 }
 0x251   :  { %v149_v57 = vmul.f32 %v147_v56, %v126_v48  ;;  %v260_v48 = vld [vmem:[%s1473_s0 + $0xa] sm:$0x1]  ;;  %v279_v56 = vrot.slane %v262_v52, 5 }
 0x252   :  { %v275_v50 = vrot.slane %v260_v48, 7  ;;  %v368_v48 = vld [vmem:[%s1473_s0 + $0x2b] sm:$0x1] }
 0x253   :  { %151 = vrot.lane.b32.xlu2 %v149_v57, %s1010_s4  ;;  %v387_v52 = vrot.slane %v368_v48, 3 }
 0x2ad   :  { %v152_v21 = vpop.permute.xlu2 %151 }
 0x2ae   :  { %154 = vst.msk [vmem:[#allocation2] sm:$0xff] %vm31_vm7, %v152_v21 }
 0x2af   :  { %186 = vst.msk [vmem:[#allocation2] sm:$0xff] %vm73_vm8, %v184_v20 }
 0x2b6   :  { %v187_v22 = vld [vmem:[#allocation2] sm:$0xff] }
 0x2b7   :  { %923 = vmatmul.msk.f32.vlgmr.msra.gmra.mxu1 %vm85_vm9, %v187_v22 }
 0x334   :  { %v214_v23 = vpop.f32.mrf.mxu1 }
 0x335   :  { %v215_v24 = vadd.f32 %v1159_v32, %v214_v23 }
 0x337   :  { %952 = vtanh.f32 %v215_v24  ;;  %v924_v26 = vmul.f32 -1.442695, %v215_v24 }
 0x339   :  { %954 = vpow2.f32 %v924_v26 }
 0x33d   :  { %v953_v25 = vpop.eup %952 }
 0x33e   :  { %239 = vrot.lane.b32.xlu0 %v953_v25, %s1009_s23 }
 0x33f   :  { %v955_v27 = vpop.eup %954 }
 0x340   :  { %v220_v28 = vadd.f32 1.0, %v955_v27 }
 0x342   :  { %956 = vrcp.f32 %v220_v28  ;;  %v232_v35 = vand.u32 2147483648, %v220_v28  ;;  %vm226_vm15 = vweird.f32 %v220_v28  ;;  %v230_v36 = vand.u32 2147483647, %v220_v28 }
 0x344   :  { %v233_v38 = vor.u32 1.1754944e-38, %v232_v35  ;;  %vm231_vm11 = vcmp.eq.f32.partialorder %v230_v36, 8.507059e+37 }
 0x348   :  { %v957_v29 = vpop.eup %956 }
 0x349   :  { %v222_v30 = vmul.f32 %v957_v29, %v220_v28  ;;  %vm227_vm14 = vweird.f32 %v957_v29 }
 0x34a   :  { %vm228_vm10 = vmor %vm226_vm15, %vm227_vm14 }
 0x34b   :  { %v223_v31 = vsub.f32 1.0, %v222_v30 }
 0x34d   :  { %v224_v33 = vmul.f32 %v957_v29, %v223_v31 }
 0x34f   :  { %v225_v34 = vadd.f32 %v957_v29, %v224_v33 }
 0x351   :  { %v229_v37 = vsel %vm228_vm10, %v957_v29, %v225_v34 }
 0x352   :  { %v234_v40 = vsel %vm231_vm11, %v233_v38, %v229_v37  ;;  %v364_v38 = vld [vmem:[%s1473_s0 + $0xb] sm:$0x1] }
 0x353   :  { %v237_v42 = vmul.f32 %v234_v40, %v143_v54  ;;  %v276_v54 = vsel %vm52_vm0, %v275_v50, %v259_v51  ;;  %v369_v51 = vld [vmem:[%s1473_s0 + $0x33] sm:$0x1] }
 0x354   :  { %v278_v57 = vsel %vm55_vm1, %v277_v53, %v276_v54  ;;  %v370_v54 = vld [vmem:[%s1473_s0 + $0x3b] sm:$0x1]  ;;  %v389_v55 = vrot.slane %v369_v51, 2 }
 0x355   :  { %v280_v60 = vsel %vm58_vm2, %v279_v56, %v278_v57  ;;  %v391_v57 = vrot.slane %v370_v54, 1 }
 0x356   :  { %v282_v63 = vsel %vm61_vm3, %v281_v59, %v280_v60 }
 0x357   :  { %v284_v6 = vsel %vm64_vm4, %v283_v62, %v282_v63 }
 0x358   :  { %v286_v9 = vsel %vm67_vm5, %v285_v1, %v284_v6 }
 0x359   :  { %v288_v10 = vsel %vm70_vm6, %v287_v8, %v286_v9 }
 0x3b0   :  { %v240_v39 = vpop.permute.xlu0 %239 }
 0x3b1   :  { %v242_v41 = vmul.f32 %v240_v39, %v234_v40  ;;  %v365_v39 = vld [vmem:[%s1473_s0 + $0x13] sm:$0x1] }
 0x3b3   :  { %244 = vrot.lane.b32.xlu1 %v242_v41, %s1009_s23  ;;  %v363_v41 = vld [vmem:[%s1473_s0 + $0x3] sm:$0x1] }
 0x425   :  { %v245_v43 = vpop.permute.xlu1 %244 }
 0x426   :  { %v247_v44 = vadd.f32 %v245_v43, %v237_v42  ;;  %v366_v42 = vld [vmem:[%s1473_s0 + $0x1b] sm:$0x1]  ;;  %v381_v43 = vrot.slane %v365_v39, 6 }
 0x428   :  { %958 = vtanh.f32 %v247_v44 }
 0x42e   :  { %v959_v45 = vpop.eup %958 }
 0x42f   :  { %250 = vrot.lane.b32.xlu2 %v959_v45, %s1009_s23  ;;  %v367_v45 = vld [vmem:[%s1473_s0 + $0x23] sm:$0x1] }
 0x430   :  { %v385_v49 = vrot.slane %v367_v45, 4 }
 0x489   :  { %v251_v46 = vpop.permute.xlu2 %250 }
 0x48a   :  { %v253_v47 = vmul.f32 %v251_v46, %v234_v40  ;;  %v379_v40 = vrot.slane %v364_v38, 7  ;;  %v383_v46 = vrot.slane %v366_v42, 5  ;;  %v472_v38 = vld [vmem:[%s1473_s0 + $0x2c] sm:$0x1] }
 0x48b   :  { %v491_v42 = vrot.slane %v472_v38, 3 }
 0x48c   :  { %255 = vrot.lane.b32.xlu0 %v253_v47, %s1010_s4 }
 0x4fe   :  { %v256_v11 = vpop.permute.xlu0 %255 }
 0x4ff   :  { %258 = vst.msk [vmem:[#allocation2] sm:$0xff] %vm31_vm7, %v256_v11 }
 0x500   :  { %290 = vst.msk [vmem:[#allocation2] sm:$0xff] %vm73_vm8, %v288_v10 }
 0x507   :  { %v291_v12 = vld [vmem:[#allocation2] sm:$0xff] }
 0x508   :  { %925 = vmatmul.msk.f32.vlgmr.msra.gmra.mxu2 %vm85_vm9, %v291_v12 }
 0x58b   :  { %v318_v13 = vpop.f32.mrf.mxu2 }
 0x58c   :  { %v319_v14 = vadd.f32 %v1159_v32, %v318_v13 }
 0x58e   :  { %960 = vtanh.f32 %v319_v14  ;;  %v926_v16 = vmul.f32 -1.442695, %v319_v14 }
 0x590   :  { %962 = vpow2.f32 %v926_v16 }
 0x594   :  { %v961_v15 = vpop.eup %960 }
 0x595   :  { %343 = vrot.lane.b32.xlu1 %v961_v15, %s1009_s23 }
 0x596   :  { %v963_v17 = vpop.eup %962 }
 0x597   :  { %v324_v18 = vadd.f32 1.0, %v963_v17 }
 0x599   :  { %964 = vrcp.f32 %v324_v18  ;;  %v336_v24 = vand.u32 2147483648, %v324_v18  ;;  %vm330_vm13 = vweird.f32 %v324_v18  ;;  %v334_v25 = vand.u32 2147483647, %v324_v18 }
 0x59b   :  { %v337_v27 = vor.u32 1.1754944e-38, %v336_v24  ;;  %vm335_vm15 = vcmp.eq.f32.partialorder %v334_v25, 8.507059e+37 }
 0x59f   :  { %v965_v19 = vpop.eup %964 }
 0x5a0   :  { %v326_v20 = vmul.f32 %v965_v19, %v324_v18  ;;  %vm331_vm12 = vweird.f32 %v965_v19 }
 0x5a1   :  { %vm332_vm14 = vmor %vm330_vm13, %vm331_vm12 }
 0x5a2   :  { %v327_v21 = vsub.f32 1.0, %v326_v20 }
 0x5a4   :  { %v328_v22 = vmul.f32 %v965_v19, %v327_v21 }
 0x5a6   :  { %v329_v23 = vadd.f32 %v965_v19, %v328_v22 }
 0x5a8   :  { %v333_v26 = vsel %vm332_vm14, %v965_v19, %v329_v23 }
 0x5a9   :  { %v338_v29 = vsel %vm335_vm15, %v337_v27, %v333_v26  ;;  %v468_v27 = vld [vmem:[%s1473_s0 + $0xc] sm:$0x1] }
 0x5aa   :  { %v341_v31 = vmul.f32 %v338_v29, %v247_v44  ;;  %v380_v44 = vsel %vm52_vm0, %v379_v40, %v363_v41  ;;  %v473_v41 = vld [vmem:[%s1473_s0 + $0x34] sm:$0x1] }
 0x5ab   :  { %v382_v47 = vsel %vm55_vm1, %v381_v43, %v380_v44  ;;  %v474_v44 = vld [vmem:[%s1473_s0 + $0x3c] sm:$0x1]  ;;  %v493_v45 = vrot.slane %v473_v41, 2 }
 0x5ac   :  { %v384_v50 = vsel %vm58_vm2, %v383_v46, %v382_v47  ;;  %v495_v47 = vrot.slane %v474_v44, 1 }
 0x5ad   :  { %v386_v53 = vsel %vm61_vm3, %v385_v49, %v384_v50 }
 0x5ae   :  { %v388_v56 = vsel %vm64_vm4, %v387_v52, %v386_v53 }
 0x5af   :  { %v390_v58 = vsel %vm67_vm5, %v389_v55, %v388_v56 }
 0x5b0   :  { %v392_v59 = vsel %vm70_vm6, %v391_v57, %v390_v58 }
 0x607   :  { %v344_v28 = vpop.permute.xlu1 %343 }
 0x608   :  { %v346_v30 = vmul.f32 %v344_v28, %v338_v29  ;;  %v469_v28 = vld [vmem:[%s1473_s0 + $0x14] sm:$0x1] }
 0x60a   :  { %348 = vrot.lane.b32.xlu2 %v346_v30, %s1009_s23  ;;  %v467_v30 = vld [vmem:[%s1473_s0 + $0x4] sm:$0x1] }
 0x664   :  { %v349_v33 = vpop.permute.xlu2 %348 }
 0x665   :  { %v351_v34 = vadd.f32 %v349_v33, %v341_v31  ;;  %v470_v31 = vld [vmem:[%s1473_s0 + $0x1c] sm:$0x1]  ;;  %v485_v33 = vrot.slane %v469_v28, 6 }
 0x667   :  { %966 = vtanh.f32 %v351_v34 }
 0x66d   :  { %v967_v35 = vpop.eup %966 }
 0x66e   :  { %354 = vrot.lane.b32.xlu0 %v967_v35, %s1009_s23  ;;  %v471_v35 = vld [vmem:[%s1473_s0 + $0x24] sm:$0x1] }
 0x66f   :  { %v489_v39 = vrot.slane %v471_v35, 4 }
 0x6e0   :  { %v355_v36 = vpop.permute.xlu0 %354 }
 0x6e1   :  { %v357_v37 = vmul.f32 %v355_v36, %v338_v29  ;;  %v483_v29 = vrot.slane %v468_v27, 7  ;;  %v487_v36 = vrot.slane %v470_v31, 5  ;;  %v576_v27 = vld [vmem:[%s1473_s0 + $0x2d] sm:$0x1] }
 0x6e2   :  { %v595_v31 = vrot.slane %v576_v27, 3 }
 0x6e3   :  { %359 = vrot.lane.b32.xlu1 %v357_v37, %s1010_s4 }
 0x755   :  { %v360_v60 = vpop.permute.xlu1 %359 }
 0x756   :  { %362 = vst.msk [vmem:[#allocation2] sm:$0xff] %vm31_vm7, %v360_v60 }
 0x757   :  { %394 = vst.msk [vmem:[#allocation2] sm:$0xff] %vm73_vm8, %v392_v59 }
 0x75e   :  { %v395_v61 = vld [vmem:[#allocation2] sm:$0xff] }
 0x75f   :  { %927 = vmatmul.msk.f32.vlgmr.msra.gmra.mxu3 %vm85_vm9, %v395_v61 }
 0x7e2   :  { %v422_v62 = vpop.f32.mrf.mxu3 }
 0x7e3   :  { %v423_v63 = vadd.f32 %v1159_v32, %v422_v62 }
 0x7e5   :  { %968 = vtanh.f32 %v423_v63  ;;  %v928_v1 = vmul.f32 -1.442695, %v423_v63 }
 0x7e7   :  { %970 = vpow2.f32 %v928_v1 }
 0x7eb   :  { %v969_v0 = vpop.eup %968 }
 0x7ec   :  { %447 = vrot.lane.b32.xlu2 %v969_v0, %s1009_s23 }
 0x7ed   :  { %v971_v6 = vpop.eup %970 }
 0x7ee   :  { %v428_v8 = vadd.f32 1.0, %v971_v6 }
 0x7f0   :  { %972 = vrcp.f32 %v428_v8  ;;  %v440_v14 = vand.u32 2147483648, %v428_v8  ;;  %vm434_vm11 = vweird.f32 %v428_v8  ;;  %v438_v15 = vand.u32 2147483647, %v428_v8 }
 0x7f2   :  { %v441_v17 = vor.u32 1.1754944e-38, %v440_v14  ;;  %vm439_vm13 = vcmp.eq.f32.partialorder %v438_v15, 8.507059e+37 }
 0x7f6   :  { %v973_v9 = vpop.eup %972 }
 0x7f7   :  { %v430_v10 = vmul.f32 %v973_v9, %v428_v8  ;;  %vm435_vm10 = vweird.f32 %v973_v9 }
 0x7f8   :  { %vm436_vm12 = vmor %vm434_vm11, %vm435_vm10 }
 0x7f9   :  { %v431_v11 = vsub.f32 1.0, %v430_v10 }
 0x7fb   :  { %v432_v12 = vmul.f32 %v973_v9, %v431_v11 }
 0x7fd   :  { %v433_v13 = vadd.f32 %v973_v9, %v432_v12 }
 0x7ff   :  { %v437_v16 = vsel %vm436_vm12, %v973_v9, %v433_v13 }
 0x800   :  { %v442_v19 = vsel %vm439_vm13, %v441_v17, %v437_v16  ;;  %v572_v17 = vld [vmem:[%s1473_s0 + $0xd] sm:$0x1] }
 0x801   :  { %v445_v21 = vmul.f32 %v442_v19, %v351_v34  ;;  %v484_v34 = vsel %vm52_vm0, %v483_v29, %v467_v30  ;;  %v577_v30 = vld [vmem:[%s1473_s0 + $0x35] sm:$0x1] }
 0x802   :  { %v486_v37 = vsel %vm55_vm1, %v485_v33, %v484_v34  ;;  %v578_v34 = vld [vmem:[%s1473_s0 + $0x3d] sm:$0x1]  ;;  %v597_v35 = vrot.slane %v577_v30, 2 }
 0x803   :  { %v488_v40 = vsel %vm58_vm2, %v487_v36, %v486_v37  ;;  %v599_v37 = vrot.slane %v578_v34, 1 }
 0x804   :  { %v490_v43 = vsel %vm61_vm3, %v489_v39, %v488_v40 }
 0x805   :  { %v492_v46 = vsel %vm64_vm4, %v491_v42, %v490_v43 }
 0x806   :  { %v494_v48 = vsel %vm67_vm5, %v493_v45, %v492_v46 }
 0x807   :  { %v496_v49 = vsel %vm70_vm6, %v495_v47, %v494_v48 }
 0x846   :  { %v448_v18 = vpop.permute.xlu2 %447 }
 0x847   :  { %v450_v20 = vmul.f32 %v448_v18, %v442_v19  ;;  %v573_v18 = vld [vmem:[%s1473_s0 + $0x15] sm:$0x1] }
 0x849   :  { %452 = vrot.lane.b32.xlu0 %v450_v20, %s1009_s23  ;;  %v571_v20 = vld [vmem:[%s1473_s0 + $0x5] sm:$0x1] }
 0x8bb   :  { %v453_v22 = vpop.permute.xlu0 %452 }
 0x8bc   :  { %v455_v23 = vadd.f32 %v453_v22, %v445_v21  ;;  %v574_v21 = vld [vmem:[%s1473_s0 + $0x1d] sm:$0x1]  ;;  %v589_v22 = vrot.slane %v573_v18, 6 }
 0x8be   :  { %974 = vtanh.f32 %v455_v23 }
 0x8c4   :  { %v975_v24 = vpop.eup %974 }
 0x8c5   :  { %458 = vrot.lane.b32.xlu1 %v975_v24, %s1009_s23  ;;  %v575_v24 = vld [vmem:[%s1473_s0 + $0x25] sm:$0x1] }
 0x8c6   :  { %v593_v28 = vrot.slane %v575_v24, 4 }
 0x937   :  { %v459_v25 = vpop.permute.xlu1 %458 }
 0x938   :  { %v461_v26 = vmul.f32 %v459_v25, %v442_v19  ;;  %v587_v19 = vrot.slane %v572_v17, 7  ;;  %v591_v25 = vrot.slane %v574_v21, 5  ;;  %v680_v17 = vld [vmem:[%s1473_s0 + $0x2e] sm:$0x1] }
 0x939   :  { %v699_v21 = vrot.slane %v680_v17, 3 }
 0x93a   :  { %463 = vrot.lane.b32.xlu2 %v461_v26, %s1010_s4 }
 0x994   :  { %v464_v50 = vpop.permute.xlu2 %463 }
 0x995   :  { %466 = vst.msk [vmem:[#allocation2] sm:$0xff] %vm31_vm7, %v464_v50 }
 0x996   :  { %498 = vst.msk [vmem:[#allocation2] sm:$0xff] %vm73_vm8, %v496_v49 }
 0x99d   :  { %v499_v51 = vld [vmem:[#allocation2] sm:$0xff] }
 0x99e   :  { %929 = vmatmul.msk.f32.vlgmr.msrb.gmra.mxu0 %vm85_vm9, %v499_v51 }
 0xa1b   :  { %v526_v52 = vpop.f32.mrf.mxu0 }
 0xa1c   :  { %v527_v53 = vadd.f32 %v1159_v32, %v526_v52 }
 0xa1e   :  { %976 = vtanh.f32 %v527_v53  ;;  %v930_v55 = vmul.f32 -1.442695, %v527_v53 }
 0xa20   :  { %978 = vpow2.f32 %v930_v55 }
 0xa24   :  { %v977_v54 = vpop.eup %976 }
 0xa25   :  { %551 = vrot.lane.b32.xlu0 %v977_v54, %s1009_s23 }
 0xa26   :  { %v979_v56 = vpop.eup %978 }
 0xa27   :  { %v532_v57 = vadd.f32 1.0, %v979_v56 }
 0xa29   :  { %980 = vrcp.f32 %v532_v57  ;;  %v544_v63 = vand.u32 2147483648, %v532_v57  ;;  %vm538_vm15 = vweird.f32 %v532_v57  ;;  %v542_v0 = vand.u32 2147483647, %v532_v57 }
 0xa2b   :  { %v545_v6 = vor.u32 1.1754944e-38, %v544_v63  ;;  %vm543_vm11 = vcmp.eq.f32.partialorder %v542_v0, 8.507059e+37 }
 0xa2f   :  { %v981_v58 = vpop.eup %980 }
 0xa30   :  { %v534_v59 = vmul.f32 %v981_v58, %v532_v57  ;;  %vm539_vm14 = vweird.f32 %v981_v58 }
 0xa31   :  { %vm540_vm10 = vmor %vm538_vm15, %vm539_vm14 }
 0xa32   :  { %v535_v60 = vsub.f32 1.0, %v534_v59 }
 0xa34   :  { %v536_v61 = vmul.f32 %v981_v58, %v535_v60 }
 0xa36   :  { %v537_v62 = vadd.f32 %v981_v58, %v536_v61 }
 0xa38   :  { %v541_v1 = vsel %vm540_vm10, %v981_v58, %v537_v62 }
 0xa39   :  { %v546_v9 = vsel %vm543_vm11, %v545_v6, %v541_v1  ;;  %v676_v6 = vld [vmem:[%s1473_s0 + $0xe] sm:$0x1] }
 0xa3a   :  { %v549_v11 = vmul.f32 %v546_v9, %v455_v23  ;;  %v588_v23 = vsel %vm52_vm0, %v587_v19, %v571_v20  ;;  %v681_v20 = vld [vmem:[%s1473_s0 + $0x36] sm:$0x1] }
 0xa3b   :  { %v590_v26 = vsel %vm55_vm1, %v589_v22, %v588_v23  ;;  %v682_v23 = vld [vmem:[%s1473_s0 + $0x3e] sm:$0x1]  ;;  %v701_v24 = vrot.slane %v681_v20, 2 }
 0xa3c   :  { %v592_v29 = vsel %vm58_vm2, %v591_v25, %v590_v26  ;;  %v703_v26 = vrot.slane %v682_v23, 1 }
 0xa3d   :  { %v594_v33 = vsel %vm61_vm3, %v593_v28, %v592_v29 }
 0xa3e   :  { %v596_v36 = vsel %vm64_vm4, %v595_v31, %v594_v33 }
 0xa3f   :  { %v598_v38 = vsel %vm67_vm5, %v597_v35, %v596_v36 }
 0xa40   :  { %v600_v39 = vsel %vm70_vm6, %v599_v37, %v598_v38 }
 0xa97   :  { %v552_v8 = vpop.permute.xlu0 %551 }
 0xa98   :  { %v554_v10 = vmul.f32 %v552_v8, %v546_v9  ;;  %v677_v8 = vld [vmem:[%s1473_s0 + $0x16] sm:$0x1] }
 0xa9a   :  { %556 = vrot.lane.b32.xlu1 %v554_v10, %s1009_s23  ;;  %v675_v10 = vld [vmem:[%s1473_s0 + $0x6] sm:$0x1] }
 0xb0c   :  { %v557_v12 = vpop.permute.xlu1 %556 }
 0xb0d   :  { %v559_v13 = vadd.f32 %v557_v12, %v549_v11  ;;  %v678_v11 = vld [vmem:[%s1473_s0 + $0x1e] sm:$0x1]  ;;  %v693_v12 = vrot.slane %v677_v8, 6 }
 0xb0f   :  { %982 = vtanh.f32 %v559_v13 }
 0xb15   :  { %v983_v14 = vpop.eup %982 }
 0xb16   :  { %562 = vrot.lane.b32.xlu2 %v983_v14, %s1009_s23  ;;  %v679_v14 = vld [vmem:[%s1473_s0 + $0x26] sm:$0x1] }
 0xb17   :  { %v697_v18 = vrot.slane %v679_v14, 4 }
 0xb70   :  { %v563_v15 = vpop.permute.xlu2 %562 }
 0xb71   :  { %v565_v16 = vmul.f32 %v563_v15, %v546_v9  ;;  %v691_v9 = vrot.slane %v676_v6, 7  ;;  %v695_v15 = vrot.slane %v678_v11, 5 }
 0xb73   :  { %567 = vrot.lane.b32.xlu0 %v565_v16, %s1010_s4 }
 0xbe5   :  { %v568_v40 = vpop.permute.xlu0 %567 }
 0xbe6   :  { %570 = vst.msk [vmem:[#allocation2] sm:$0xff] %vm31_vm7, %v568_v40 }
 0xbe7   :  { %602 = vst.msk [vmem:[#allocation2] sm:$0xff] %vm73_vm8, %v600_v39 }
 0xbee   :  { %v603_v41 = vld [vmem:[#allocation2] sm:$0xff] }
 0xbef   :  { %931 = vmatmul.msk.f32.vlgmr.msrb.gmra.mxu1 %vm85_vm9, %v603_v41 }
 0xc6c   :  { %v630_v42 = vpop.f32.mrf.mxu1 }
 0xc6d   :  { %v631_v43 = vadd.f32 %v1159_v32, %v630_v42 }
 0xc6f   :  { %984 = vtanh.f32 %v631_v43  ;;  %v932_v45 = vmul.f32 -1.442695, %v631_v43 }
 0xc71   :  { %986 = vpow2.f32 %v932_v45 }
 0xc75   :  { %v985_v44 = vpop.eup %984 }
 0xc76   :  { %655 = vrot.lane.b32.xlu1 %v985_v44, %s1009_s23 }
 0xc77   :  { %v987_v46 = vpop.eup %986 }
 0xc78   :  { %v636_v47 = vadd.f32 1.0, %v987_v46 }
 0xc7a   :  { %988 = vrcp.f32 %v636_v47  ;;  %v648_v53 = vand.u32 2147483648, %v636_v47  ;;  %vm642_vm13 = vweird.f32 %v636_v47  ;;  %v646_v54 = vand.u32 2147483647, %v636_v47 }
 0xc7c   :  { %v649_v56 = vor.u32 1.1754944e-38, %v648_v53  ;;  %vm647_vm15 = vcmp.eq.f32.partialorder %v646_v54, 8.507059e+37  ;;  %v817_v54 = vld [vmem:[%s1471_s3 + $0x28] sm:$0xff] }
 0xc7d   :  { %831 = vmatpush.msrb.mxu3 %v817_v54 }
 0xc7f   :  { %832 = vmatpush.msrb.mxu3 %v1061_v2  ;;  %v781_v2 = vld [vmem:[%s1473_s0 + $0x17] sm:$0x1] }
 0xc80   :  { %v989_v48 = vpop.eup %988 }
 0xc81   :  { %v638_v49 = vmul.f32 %v989_v48, %v636_v47  ;;  %vm643_vm12 = vweird.f32 %v989_v48  ;;  %833 = vmatpush.msrb.mxu3 %v1068_v3  ;;  %v779_v3 = vld [vmem:[%s1473_s0 + $0x7] sm:$0x1] }
 0xc82   :  { %vm644_vm14 = vmor %vm642_vm13, %vm643_vm12 }
 0xc83   :  { %v639_v50 = vsub.f32 1.0, %v638_v49  ;;  %834 = vmatpush.msrb.mxu3 %v1073_v4  ;;  %v782_v4 = vld [vmem:[%s1473_s0 + $0x1f] sm:$0x1] }
 0xc85   :  { %v640_v51 = vmul.f32 %v989_v48, %v639_v50  ;;  %835 = vmatpush.msrb.mxu3 %v1082_v5  ;;  %v797_v5 = vrot.slane %v781_v2, 6 }
 0xc87   :  { %v641_v52 = vadd.f32 %v989_v48, %v640_v51  ;;  %836 = vmatpush.msrb.mxu3 %v1094_v7 }
 0xc89   :  { %v645_v55 = vsel %vm644_vm14, %v989_v48, %v641_v52 }
 0xc8a   :  { %v650_v58 = vsel %vm647_vm15, %v649_v56, %v645_v55 }
 0xc8b   :  { %v653_v60 = vmul.f32 %v650_v58, %v559_v13  ;;  %v692_v13 = vsel %vm52_vm0, %v691_v9, %v675_v10  ;;  %v786_v9 = vld [vmem:[%s1473_s0 + $0x3f] sm:$0x1] }
 0xc8c   :  { %v694_v16 = vsel %vm55_vm1, %v693_v12, %v692_v13  ;;  %v807_v12 = vrot.slane %v786_v9, 1 }
 0xc8d   :  { %v696_v19 = vsel %vm58_vm2, %v695_v15, %v694_v16 }
 0xc8e   :  { %v698_v22 = vsel %vm61_vm3, %v697_v18, %v696_v19 }
 0xc8f   :  { %v700_v25 = vsel %vm64_vm4, %v699_v21, %v698_v22 }
 0xc90   :  { %v702_v27 = vsel %vm67_vm5, %v701_v24, %v700_v25 }
 0xc91   :  { %v704_v28 = vsel %vm70_vm6, %v703_v26, %v702_v27 }
 0xce8   :  { %v656_v57 = vpop.permute.xlu1 %655 }
 0xce9   :  { %v658_v59 = vmul.f32 %v656_v57, %v650_v58  ;;  %v780_v57 = vld [vmem:[%s1473_s0 + $0xf] sm:$0x1] }
 0xceb   :  { %660 = vrot.lane.b32.xlu2 %v658_v59, %s1009_s23  ;;  %v783_v59 = vld [vmem:[%s1473_s0 + $0x27] sm:$0x1] }
 0xd45   :  { %v661_v61 = vpop.permute.xlu2 %660 }
 0xd46   :  { %v663_v62 = vadd.f32 %v661_v61, %v653_v60  ;;  %v799_v60 = vrot.slane %v782_v4, 5 }
 0xd48   :  { %990 = vtanh.f32 %v663_v62 }
 0xd4e   :  { %v991_v63 = vpop.eup %990 }
 0xd4f   :  { %666 = vrot.lane.b32.xlu0 %v991_v63, %s1009_s23  ;;  %v801_v63 = vrot.slane %v783_v59, 4 }
 0xdc1   :  { %v667_v0 = vpop.permute.xlu0 %666 }
 0xdc2   :  { %v669_v1 = vmul.f32 %v667_v0, %v650_v58  ;;  %v795_v58 = vrot.slane %v780_v57, 7 }
 0xdc4   :  { %671 = vrot.lane.b32.xlu1 %v669_v1, %s1010_s4  ;;  %v796_v7 = vsel %vm52_vm0, %v795_v58, %v779_v3  ;;  %v785_v1 = vld [vmem:[%s1473_s0 + $0x37] sm:$0x1] }
 0xdc5   :  { %v798_v61 = vsel %vm55_vm1, %v797_v5, %v796_v7  ;;  %v805_v10 = vrot.slane %v785_v1, 2 }
 0xdc6   :  { %v800_v0 = vsel %vm58_vm2, %v799_v60, %v798_v61 }
 0xdc7   :  { %v802_v8 = vsel %vm61_vm3, %v801_v63, %v800_v0 }
 0xe36   :  { %v672_v29 = vpop.permute.xlu1 %671 }
 0xe37   :  { %674 = vst.msk [vmem:[#allocation2] sm:$0xff] %vm31_vm7, %v672_v29 }
 0xe38   :  { %706 = vst.msk [vmem:[#allocation2] sm:$0xff] %vm73_vm8, %v704_v28 }
 0xe3f   :  { %v707_v30 = vld [vmem:[#allocation2] sm:$0xff] }
 0xe40   :  { %933 = vmatmul.msk.f32.vlgmr.msrb.gmra.mxu2 %vm85_vm9, %v707_v30 }
 0xec3   :  { %v734_v31 = vpop.f32.mrf.mxu2 }
 0xec4   :  { %v735_v33 = vadd.f32 %v1159_v32, %v734_v31 }
 0xec6   :  { %992 = vtanh.f32 %v735_v33  ;;  %v934_v35 = vmul.f32 -1.442695, %v735_v33 }
 0xec8   :  { %994 = vpow2.f32 %v934_v35 }
 0xecc   :  { %v993_v34 = vpop.eup %992 }
 0xecd   :  { %759 = vrot.lane.b32.xlu2 %v993_v34, %s1009_s23 }
 0xece   :  { %v995_v36 = vpop.eup %994 }
 0xecf   :  { %v740_v37 = vadd.f32 1.0, %v995_v36 }
 0xed1   :  { %996 = vrcp.f32 %v740_v37  ;;  %v752_v43 = vand.u32 2147483648, %v740_v37  ;;  %vm746_vm11 = vweird.f32 %v740_v37  ;;  %v750_v44 = vand.u32 2147483647, %v740_v37 }
 0xed3   :  { %v753_v46 = vor.u32 1.1754944e-38, %v752_v43  ;;  %vm751_vm13 = vcmp.eq.f32.partialorder %v750_v44, 8.507059e+37 }
 0xed7   :  { %v997_v38 = vpop.eup %996 }
 0xed8   :  { %v742_v39 = vmul.f32 %v997_v38, %v740_v37  ;;  %vm747_vm10 = vweird.f32 %v997_v38 }
 0xed9   :  { %vm748_vm12 = vmor %vm746_vm11, %vm747_vm10 }
 0xeda   :  { %v743_v40 = vsub.f32 1.0, %v742_v39  ;;  %v886_v39 = vld [vmem:[%s1475_s5 + $0x18] sm:$0xff] }
 0xedb   :  { %908 = vmatpush.msra.mxu0 %v886_v39 }
 0xedc   :  { %v744_v41 = vmul.f32 %v997_v38, %v743_v40  ;;  %v885_v40 = vld [vmem:[%s1475_s5 + $0x10] sm:$0xff] }
 0xedd   :  { %909 = vmatpush.msra.mxu0 %v885_v40 }
 0xede   :  { %v745_v42 = vadd.f32 %v997_v38, %v744_v41  ;;  %v884_v41 = vld [vmem:[%s1475_s5 + $0x8] sm:$0xff] }
 0xedf   :  { %910 = vmatpush.msra.mxu0 %v884_v41 }
 0xee0   :  { %v749_v45 = vsel %vm748_vm12, %v997_v38, %v745_v42  ;;  %v883_v42 = vld [vmem:[%s1475_s5] sm:$0xff] }
 0xee1   :  { %v754_v48 = vsel %vm751_vm13, %v753_v46, %v749_v45  ;;  %911 = vmatpush.msra.mxu0 %v883_v42 }
 0xee2   :  { %v757_v50 = vmul.f32 %v754_v48, %v663_v62  ;;  %v784_v62 = vld [vmem:[%s1473_s0 + $0x2f] sm:$0x1] }
 0xee3   :  { %v803_v6 = vrot.slane %v784_v62, 3 }
 0xee5   :  { %v804_v11 = vsel %vm64_vm4, %v803_v6, %v802_v8  ;;  %vm893_vm4 = vcmask 261120  }
 0xee6   :  { %v806_v13 = vsel %vm67_vm5, %v805_v10, %v804_v11 }
 0xee7   :  { %v808_v14 = vsel %vm70_vm6, %v807_v12, %v806_v13 }
 0xf27   :  { %v760_v47 = vpop.permute.xlu2 %759 }
 0xf28   :  { %v762_v49 = vmul.f32 %v760_v47, %v754_v48  ;;  %v943_v47 = vld [vmem:[%s1476_s6] ss:$0 sm:$0xff] }
 0xf2a   :  { %764 = vrot.lane.b32.xlu0 %v762_v49, %s1009_s23 }
 0xf9c   :  { %v765_v51 = vpop.permute.xlu0 %764 }
 0xf9d   :  { %v1398_v52 = vadd.f32 %v765_v51, %v757_v50 }
 0xf9f   :  { %998 = vtanh.f32 %v1398_v52 }
 0xfa5   :  { %v999_v53 = vpop.eup %998 }
 0xfa6   :  { %770 = vrot.lane.b32.xlu1 %v999_v53, %s1009_s23 }
0x1018   :  { %v771_v55 = vpop.permute.xlu1 %770 }
0x1019   :  { %v773_v56 = vmul.f32 %v771_v55, %v754_v48 }
0x101b   :  { %775 = vrot.lane.b32.xlu2 %v773_v56, %s1010_s4 }
0x1075   :  { %v776_v15 = vpop.permute.xlu2 %775 }
0x1076   :  { %778 = vst.msk [vmem:[#allocation2] sm:$0xff] %vm31_vm7, %v776_v15 }
0x1077   :  { %810 = vst.msk [vmem:[#allocation2] sm:$0xff] %vm73_vm8, %v808_v14 }
0x107e   :  { %v811_v16 = vld [vmem:[#allocation2] sm:$0xff] }
0x107f   :  { %935 = vmatmul.msk.f32.vlgmr.msrb.gmra.mxu3 %vm85_vm9, %v811_v16 }
0x1102   :  { %v838_v17 = vpop.f32.mrf.mxu3 }
0x1103   :  { %v839_v18 = vadd.f32 %v1159_v32, %v838_v17 }
0x1105   :  { %1000 = vtanh.f32 %v839_v18  ;;  %v936_v20 = vmul.f32 -1.442695, %v839_v18 }
0x1107   :  { %1002 = vpow2.f32 %v936_v20 }
0x110b   :  { %v1001_v19 = vpop.eup %1000 }
0x110c   :  { %863 = vrot.lane.b32.xlu0 %v1001_v19, %s1009_s23 }
0x110d   :  { %v1003_v21 = vpop.eup %1002 }
0x110e   :  { %v844_v22 = vadd.f32 1.0, %v1003_v21 }
0x1110   :  { %1004 = vrcp.f32 %v844_v22  ;;  %v856_v28 = vand.u32 2147483648, %v844_v22  ;;  %vm850_vm1 = vweird.f32 %v844_v22  ;;  %v854_v29 = vand.u32 2147483647, %v844_v22 }
0x1112   :  { %v857_v30 = vor.u32 1.1754944e-38, %v856_v28  ;;  %vm855_vm3 = vcmp.eq.f32.partialorder %v854_v29, 8.507059e+37 }
0x1116   :  { %v1005_v23 = vpop.eup %1004 }
0x1117   :  { %v846_v24 = vmul.f32 %v1005_v23, %v844_v22  ;;  %vm851_vm0 = vweird.f32 %v1005_v23 }
0x1118   :  { %vm852_vm2 = vmor %vm850_vm1, %vm851_vm0 }
0x1119   :  { %v847_v25 = vsub.f32 1.0, %v846_v24 }
0x111b   :  { %v848_v26 = vmul.f32 %v1005_v23, %v847_v25 }
0x111d   :  { %v849_v27 = vadd.f32 %v1005_v23, %v848_v26 }
0x111f   :  { %v853_v32 = vsel %vm852_vm2, %v1005_v23, %v849_v27 }
0x1120   :  { %v858_v33 = vsel %vm855_vm3, %v857_v30, %v853_v32 }
0x1121   :  { %v861_v35 = vmul.f32 %v858_v33, %v1398_v52 }
0x117e   :  { %v864_v31 = vpop.permute.xlu0 %863 }
0x117f   :  { %v866_v34 = vmul.f32 %v864_v31, %v858_v33 }
0x1181   :  { %868 = vrot.lane.b32.xlu1 %v866_v34, %s1009_s23 }
0x11f3   :  { %v869_v36 = vpop.permute.xlu1 %868 }
0x11f4   :  { %v871_v37 = vadd.f32 %v869_v36, %v861_v35 }
0x11f6   :  { %1006 = vtanh.f32 %v871_v37 }
0x11fc   :  { %v1007_v38 = vpop.eup %1006 }
0x11fd   :  { %874 = vrot.lane.b32.xlu2 %v1007_v38, %s1009_s23  ;;  %s1011_s23 = smov 64  }
0x1257   :  { %v875_v43 = vpop.permute.xlu2 %874 }
0x1258   :  { %v877_v44 = vmul.f32 %v875_v43, %v858_v33 }
0x125a   :  { %879 = vrot.lane.b32.xlu1 %v877_v44, %s1010_s4  ;;  %891 = vrot.lane.b32.xlu0 %v877_v44, %s1011_s23 }
0x12cc   :  { %v880_v45 = vpop.permute.xlu1 %879  ;;  %v892_v46 = vpop.permute.xlu0 %891 }
0x12cd   :  { %882 = vst.msk [vmem:[#allocation2] sm:$0xff] %vm31_vm7, %v880_v45  ;;  %937 = vmatmul.msk.f32.vlgmr.msra.gmra.mxu0 %vm893_vm4, %v892_v46 }
0x134a   :  { %v913_v48 = vpop.f32.mrf.mxu0 }
0x134b   :  { %v914_v49 = vadd.f32 %v943_v47, %v913_v48 }
0x134d   :  { %916 = vst [vmem:[%s1477_s7] sm:$0xff] %v914_v49 }

</bundles_post_ra>
